<compile_context>
chip_gen: v5e
topology: v5e:2x2
jax: 0.10.0
libtpu: 0.0.40
codegen_flags: <defaults>
</compile_context>

<pallas_src>
import math

import jax
import jax.numpy as jnp
from jax import lax
from jax.experimental import pallas as pl
from jax.experimental.pallas import tpu as pltpu

WINDOW_SIZE = 11
SIGMA = 1.5
C1 = 0.01 ** 2
C2 = 0.03 ** 2


def _gaussian_1d(window_size: int, sigma: float):
    g = [math.exp(-((x - window_size // 2) ** 2) / (2.0 * sigma ** 2))
         for x in range(window_size)]
    s = sum(g)
    return [v / s for v in g]


def _band_matrix(n, taps, pad):
    """(n, n) banded Toeplitz M with M[i, j] = taps[i - j + pad] (0 off-band).

    Right-multiplying an (H, n) image by M applies the zero-padded 1-D
    correlation with `taps` along the last axis (exactly F.conv2d's padding=pad
    semantics), so no explicit image padding is needed anywhere.
    """
    win = len(taps)
    t = jnp.asarray(taps, dtype=jnp.float32)
    i = jnp.arange(n)[:, None]
    j = jnp.arange(n)[None, :]
    d = i - j + pad
    valid = (d >= 0) & (d < win)
    return jnp.where(valid, t[jnp.clip(d, 0, win - 1)], 0.0).astype(jnp.float32)


def _ssim_channel_kernel(x1_ref, x2_ref, gh_ref, gv_ref, out_ref):
    # x1_ref/x2_ref: (1, H, W) f32 block for this (n, c); gh: (W, W); gv: (H, H).
    x1 = x1_ref[0]
    x2 = x2_ref[0]
    gh = gh_ref[...]
    gv = gv_ref[...]

    def blur(f):
        # Separable 11-tap Gaussian blur as two MXU matmuls (full f32 accuracy).
        t = jnp.dot(f, gh, preferred_element_type=jnp.float32,
                    precision=jax.lax.Precision.HIGHEST)
        return jnp.dot(gv, t, preferred_element_type=jnp.float32,
                       precision=jax.lax.Precision.HIGHEST)

    mu1 = blur(x1)
    mu2 = blur(x2)
    e11 = blur(x1 * x1)
    e22 = blur(x2 * x2)
    e12 = blur(x1 * x2)

    mu1_sq = mu1 * mu1
    mu2_sq = mu2 * mu2
    mu1_mu2 = mu1 * mu2
    sigma1_sq = e11 - mu1_sq          # keep variance subtraction in f32
    sigma2_sq = e22 - mu2_sq
    sigma12 = e12 - mu1_mu2

    num = (2.0 * mu1_mu2 + C1) * (2.0 * sigma12 + C2)
    den = (mu1_sq + mu2_sq + C1) * (sigma1_sq + sigma2_sq + C2)
    # Divide via the otherwise-idle EUP reciprocal (use approx=False if exact
    # divide-rounding parity is required).
    ssim_map = num * pl.reciprocal(den, approx=True)

    # Reduce this tile to a single per-channel partial sum (lane reduce, then
    # sublane reduce) and write it broadcast into this step's lane-dense block.
    row_sums = jnp.sum(ssim_map, axis=1, keepdims=True)   # (H, 1)
    total = jnp.sum(row_sums, axis=0, keepdims=True)      # (1, 1)
    out_ref[...] = jnp.broadcast_to(total[None], out_ref.shape)


def ssim_pallas(img1, img2, window_size=WINDOW_SIZE, size_average=True):
    assert img1.shape == img2.shape and img1.ndim == 4
    N, C, H, W = img1.shape
    NC = N * C
    pad = window_size // 2
    g = _gaussian_1d(window_size, SIGMA)

    gh = _band_matrix(W, g, pad)        # horizontal taps:  X @ gh
    gv = _band_matrix(H, g, pad).T      # vertical taps:    gv @ X

    x1 = img1.astype(jnp.float32).reshape(NC, H, W)
    x2 = img2.astype(jnp.float32).reshape(NC, H, W)

    # TODO(synk): for very large H*W (where 2 images + 5 blurred fields exceed
    # the per-step VMEM budget, esp. v7x's 64 MiB), additionally tile over H in
    # halo'd row blocks; per-channel tiling is sufficient for typical sizes.
    sums = pl.pallas_call(
        _ssim_channel_kernel,
        grid=(NC,),
        out_shape=jax.ShapeDtypeStruct((NC, 8, 128), jnp.float32),
        in_specs=[
            pl.BlockSpec((1, H, W), lambda i: (i, 0, 0)),
            pl.BlockSpec((1, H, W), lambda i: (i, 0, 0)),
            pl.BlockSpec((W, W), lambda i: (0, 0)),   # constant index -> resident
            pl.BlockSpec((H, H), lambda i: (0, 0)),
        ],
        out_specs=pl.BlockSpec((1, 8, 128), lambda i: (i, 0, 0)),
        compiler_params=pltpu.CompilerParams(
            dimension_semantics=("parallel",),         # v7x: shard NC over 2 TCs
            vmem_limit_bytes=48 * 1024 * 1024,
        ),
    )(x1, x2, gh, gv)

    channel_sums = sums[:, 0, 0].reshape(N, C)
    per_image = jnp.sum(channel_sums, axis=1) / (C * H * W)
    if size_average:
        # All images share (C, H, W), so mean of per-image means == global mean.
        return jnp.mean(per_image)
    return per_image


# ----------------------- pure-JAX reference (for sanity) ----------------------

def ssim_reference(img1, img2, window_size=WINDOW_SIZE, size_average=True):
    N, C, H, W = img1.shape
    g = jnp.asarray(_gaussian_1d(window_size, SIGMA), dtype=jnp.float32)
    win2d = jnp.outer(g, g)                                   # (11, 11)
    w = jnp.broadcast_to(win2d, (C, 1, window_size, window_size))
    pad = window_size // 2

    def dwconv(x):
        return lax.conv_general_dilated(
            x.astype(jnp.float32), w,
            window_strides=(1, 1), padding=[(pad, pad), (pad, pad)],
            dimension_numbers=("NCHW", "OIHW", "NCHW"),
            feature_group_count=C,
            precision=lax.Precision.HIGHEST)

    mu1, mu2 = dwconv(img1), dwconv(img2)
    mu1_sq, mu2_sq, mu1_mu2 = mu1 * mu1, mu2 * mu2, mu1 * mu2
    s1 = dwconv(img1 * img1) - mu1_sq
    s2 = dwconv(img2 * img2) - mu2_sq
    s12 = dwconv(img1 * img2) - mu1_mu2
    m = ((2 * mu1_mu2 + C1) * (2 * s12 + C2)) / ((mu1_sq + mu2_sq + C1) * (s1 + s2 + C2))
    return jnp.mean(m) if size_average else jnp.mean(m, axis=(1, 2, 3))


if __name__ == "__main__":
    key = jax.random.PRNGKey(0)
    k1, k2 = jax.random.split(key)
    # Small shapes consistent with an image-pair SSIM loss.
    x = jax.random.uniform(k1, (2, 4, 16, 16), dtype=jnp.float32)
    y = jax.random.uniform(k2, (2, 4, 16, 16), dtype=jnp.float32)

    out = ssim_pallas(x, y, window_size=WINDOW_SIZE, size_average=True)
    out = jax.block_until_ready(out)

    ref = jax.block_until_ready(ssim_reference(x, y))
    # Small slack for approx-reciprocal / summation-order differences.
    assert abs(float(out) - float(ref)) < 5e-4, (float(out), float(ref))

    print("KERNEL_OK")
</pallas_src>

<mosaic_0001>
module attributes {stable_mosaic.version = 11 : i64} {
  func.func @_ssim_channel_kernel(%arg0: i32, %arg1: memref<1x16x16xf32, #tpu.memory_space<vmem>>, %arg2: memref<1x16x16xf32, #tpu.memory_space<vmem>>, %arg3: memref<16x16xf32, #tpu.memory_space<vmem>>, %arg4: memref<16x16xf32, #tpu.memory_space<vmem>>, %arg5: memref<1x8x128xf32, #tpu.memory_space<vmem>>) attributes {dimension_semantics = [#tpu.dimension_semantics<parallel>], iteration_bounds = array<i64: 8>, scalar_prefetch = 0 : i64, scratch_operands = 0 : i64, tpu.core_type = #tpu.core_type<tc>, window_params = [{transform_indices = @transform_0, window_bounds = array<i64: 1, 16, 16>}, {transform_indices = @transform_1, window_bounds = array<i64: 1, 16, 16>}, {pipeline_mode = #tpu.pipeline_mode<synchronous>, transform_indices = @transform_2, window_bounds = array<i64: 16, 16>}, {pipeline_mode = #tpu.pipeline_mode<synchronous>, transform_indices = @transform_3, window_bounds = array<i64: 16, 16>}, {transform_indices = @transform_4, window_bounds = array<i64: 1, 8, 128>}]} {
    %c0 = arith.constant 0 : index
    %c0_0 = arith.constant 0 : index
    %c0_1 = arith.constant 0 : index
    %0 = vector.load %arg1[%c0, %c0_0, %c0_1] : memref<1x16x16xf32, #tpu.memory_space<vmem>>, vector<1x16x16xf32>
    %1 = vector.shape_cast %0 : vector<1x16x16xf32> to vector<16x16xf32>
    %c0_2 = arith.constant 0 : index
    %c0_3 = arith.constant 0 : index
    %c0_4 = arith.constant 0 : index
    %2 = vector.load %arg2[%c0_2, %c0_3, %c0_4] : memref<1x16x16xf32, #tpu.memory_space<vmem>>, vector<1x16x16xf32>
    %3 = vector.shape_cast %2 : vector<1x16x16xf32> to vector<16x16xf32>
    %c0_5 = arith.constant 0 : index
    %c0_6 = arith.constant 0 : index
    %4 = vector.load %arg3[%c0_5, %c0_6] : memref<16x16xf32, #tpu.memory_space<vmem>>, vector<16x16xf32>
    %c0_7 = arith.constant 0 : index
    %c0_8 = arith.constant 0 : index
    %5 = vector.load %arg4[%c0_7, %c0_8] : memref<16x16xf32, #tpu.memory_space<vmem>>, vector<16x16xf32>
    %cst = arith.constant dense<0.000000e+00> : vector<16x16xf32>
    %6 = tpu.matmul %1, %4, %cst {dimension_numbers = #tpu.dot_dimension_numbers<[1], [0], [0], [1], [0, 0, 1, 1], [], []>, precision = #tpu.contract_precision<fp32>} : vector<16x16xf32>, vector<16x16xf32>, vector<16x16xf32> -> vector<16x16xf32>
    %cst_9 = arith.constant dense<0.000000e+00> : vector<16x16xf32>
    %7 = tpu.matmul %5, %6, %cst_9 {dimension_numbers = #tpu.dot_dimension_numbers<[1], [0], [0], [1], [0, 0, 1, 1], [], []>, precision = #tpu.contract_precision<fp32>} : vector<16x16xf32>, vector<16x16xf32>, vector<16x16xf32> -> vector<16x16xf32>
    %cst_10 = arith.constant dense<0.000000e+00> : vector<16x16xf32>
    %8 = tpu.matmul %3, %4, %cst_10 {dimension_numbers = #tpu.dot_dimension_numbers<[1], [0], [0], [1], [0, 0, 1, 1], [], []>, precision = #tpu.contract_precision<fp32>} : vector<16x16xf32>, vector<16x16xf32>, vector<16x16xf32> -> vector<16x16xf32>
    %cst_11 = arith.constant dense<0.000000e+00> : vector<16x16xf32>
    %9 = tpu.matmul %5, %8, %cst_11 {dimension_numbers = #tpu.dot_dimension_numbers<[1], [0], [0], [1], [0, 0, 1, 1], [], []>, precision = #tpu.contract_precision<fp32>} : vector<16x16xf32>, vector<16x16xf32>, vector<16x16xf32> -> vector<16x16xf32>
    %10 = arith.mulf %1, %1 : vector<16x16xf32>
    %cst_12 = arith.constant dense<0.000000e+00> : vector<16x16xf32>
    %11 = tpu.matmul %10, %4, %cst_12 {dimension_numbers = #tpu.dot_dimension_numbers<[1], [0], [0], [1], [0, 0, 1, 1], [], []>, precision = #tpu.contract_precision<fp32>} : vector<16x16xf32>, vector<16x16xf32>, vector<16x16xf32> -> vector<16x16xf32>
    %cst_13 = arith.constant dense<0.000000e+00> : vector<16x16xf32>
    %12 = tpu.matmul %5, %11, %cst_13 {dimension_numbers = #tpu.dot_dimension_numbers<[1], [0], [0], [1], [0, 0, 1, 1], [], []>, precision = #tpu.contract_precision<fp32>} : vector<16x16xf32>, vector<16x16xf32>, vector<16x16xf32> -> vector<16x16xf32>
    %13 = arith.mulf %3, %3 : vector<16x16xf32>
    %cst_14 = arith.constant dense<0.000000e+00> : vector<16x16xf32>
    %14 = tpu.matmul %13, %4, %cst_14 {dimension_numbers = #tpu.dot_dimension_numbers<[1], [0], [0], [1], [0, 0, 1, 1], [], []>, precision = #tpu.contract_precision<fp32>} : vector<16x16xf32>, vector<16x16xf32>, vector<16x16xf32> -> vector<16x16xf32>
    %cst_15 = arith.constant dense<0.000000e+00> : vector<16x16xf32>
    %15 = tpu.matmul %5, %14, %cst_15 {dimension_numbers = #tpu.dot_dimension_numbers<[1], [0], [0], [1], [0, 0, 1, 1], [], []>, precision = #tpu.contract_precision<fp32>} : vector<16x16xf32>, vector<16x16xf32>, vector<16x16xf32> -> vector<16x16xf32>
    %16 = arith.mulf %1, %3 : vector<16x16xf32>
    %cst_16 = arith.constant dense<0.000000e+00> : vector<16x16xf32>
    %17 = tpu.matmul %16, %4, %cst_16 {dimension_numbers = #tpu.dot_dimension_numbers<[1], [0], [0], [1], [0, 0, 1, 1], [], []>, precision = #tpu.contract_precision<fp32>} : vector<16x16xf32>, vector<16x16xf32>, vector<16x16xf32> -> vector<16x16xf32>
    %cst_17 = arith.constant dense<0.000000e+00> : vector<16x16xf32>
    %18 = tpu.matmul %5, %17, %cst_17 {dimension_numbers = #tpu.dot_dimension_numbers<[1], [0], [0], [1], [0, 0, 1, 1], [], []>, precision = #tpu.contract_precision<fp32>} : vector<16x16xf32>, vector<16x16xf32>, vector<16x16xf32> -> vector<16x16xf32>
    %19 = arith.mulf %7, %7 : vector<16x16xf32>
    %20 = arith.mulf %9, %9 : vector<16x16xf32>
    %21 = arith.mulf %7, %9 : vector<16x16xf32>
    %22 = arith.subf %12, %19 : vector<16x16xf32>
    %23 = arith.subf %15, %20 : vector<16x16xf32>
    %24 = arith.subf %18, %21 : vector<16x16xf32>
    %cst_18 = arith.constant 2.000000e+00 : f32
    %25 = vector.broadcast %cst_18 : f32 to vector<16x16xf32>
    %26 = arith.mulf %25, %21 : vector<16x16xf32>
    %cst_19 = arith.constant 9.99999974E-5 : f32
    %27 = vector.broadcast %cst_19 : f32 to vector<16x16xf32>
    %28 = arith.addf %26, %27 : vector<16x16xf32>
    %cst_20 = arith.constant 2.000000e+00 : f32
    %29 = vector.broadcast %cst_20 : f32 to vector<16x16xf32>
    %30 = arith.mulf %29, %24 : vector<16x16xf32>
    %cst_21 = arith.constant 8.99999984E-4 : f32
    %31 = vector.broadcast %cst_21 : f32 to vector<16x16xf32>
    %32 = arith.addf %30, %31 : vector<16x16xf32>
    %33 = arith.mulf %28, %32 : vector<16x16xf32>
    %34 = arith.addf %19, %20 : vector<16x16xf32>
    %cst_22 = arith.constant 9.99999974E-5 : f32
    %35 = vector.broadcast %cst_22 : f32 to vector<16x16xf32>
    %36 = arith.addf %34, %35 : vector<16x16xf32>
    %37 = arith.addf %22, %23 : vector<16x16xf32>
    %cst_23 = arith.constant 8.99999984E-4 : f32
    %38 = vector.broadcast %cst_23 : f32 to vector<16x16xf32>
    %39 = arith.addf %37, %38 : vector<16x16xf32>
    %40 = arith.mulf %36, %39 : vector<16x16xf32>
    %41 = tpu.reciprocal %40 {approx = true} : vector<16x16xf32> -> vector<16x16xf32>
    %42 = arith.mulf %33, %41 : vector<16x16xf32>
    %cst_24 = arith.constant dense<0.000000e+00> : vector<16xf32>
    %43 = vector.multi_reduction <add>, %42, %cst_24 [1] : vector<16x16xf32> to vector<16xf32>
    %44 = vector.shape_cast %43 : vector<16xf32> to vector<16x1xf32>
    %cst_25 = arith.constant dense<0.000000e+00> : vector<1xf32>
    %45 = vector.multi_reduction <add>, %44, %cst_25 [0] : vector<16x1xf32> to vector<1xf32>
    %46 = vector.shape_cast %45 : vector<1xf32> to vector<1x1xf32>
    %47 = vector.shape_cast %46 : vector<1x1xf32> to vector<1x1x1xf32>
    %48 = vector.shape_cast %47 : vector<1x1x1xf32> to vector<1x1x1xf32>
    %49 = vector.broadcast %48 : vector<1x1x1xf32> to vector<1x8x128xf32>
    %c0_26 = arith.constant 0 : index
    %c0_27 = arith.constant 0 : index
    %c0_28 = arith.constant 0 : index
    %50 = vector.load %arg5[%c0_26, %c0_27, %c0_28] : memref<1x8x128xf32, #tpu.memory_space<vmem>>, vector<1x8x128xf32>
    tpu.vector_store %arg5[%c0_26, %c0_27, %c0_28], %49 {strides = array<i32>} : memref<1x8x128xf32, #tpu.memory_space<vmem>>, vector<1x8x128xf32>,
    return
  }
  func.func @transform_0(%arg0: i32) -> (i32, i32, i32) {
    %c0_i32 = arith.constant 0 : i32
    %c0_i32_0 = arith.constant 0 : i32
    %c0_i32_1 = arith.constant 0 : i32
    return %arg0, %c0_i32, %c0_i32_0 : i32, i32, i32
  }
  func.func @transform_1(%arg0: i32) -> (i32, i32, i32) {
    %c0_i32 = arith.constant 0 : i32
    %c0_i32_0 = arith.constant 0 : i32
    %c0_i32_1 = arith.constant 0 : i32
    return %arg0, %c0_i32, %c0_i32_0 : i32, i32, i32
  }
  func.func @transform_2(%arg0: i32) -> (i32, i32) {
    %c0_i32 = arith.constant 0 : i32
    %c0_i32_0 = arith.constant 0 : i32
    %c0_i32_1 = arith.constant 0 : i32
    return %c0_i32, %c0_i32_0 : i32, i32
  }
  func.func @transform_3(%arg0: i32) -> (i32, i32) {
    %c0_i32 = arith.constant 0 : i32
    %c0_i32_0 = arith.constant 0 : i32
    %c0_i32_1 = arith.constant 0 : i32
    return %c0_i32, %c0_i32_0 : i32, i32
  }
  func.func @transform_4(%arg0: i32) -> (i32, i32, i32) {
    %c0_i32 = arith.constant 0 : i32
    %c0_i32_0 = arith.constant 0 : i32
    %c0_i32_1 = arith.constant 0 : i32
    return %arg0, %c0_i32, %c0_i32_0 : i32, i32, i32
  }
}

</mosaic_0001>

<bundles_post_ra>
// kernel: tpu_custom_call.1
= control target key start
LH: loop header
LB: loop body
LE: loop exit
PB: predicated region body
PF: predicated region fallthrough
CT: control target
= control target key end

     0   :  { %s3213_s0 = inlined_call_operand.hbm [shape: f32[8,16,16], index: 0, kind: input, shape index: {}]   ;;  %s3214_s1 = inlined_call_operand.hbm [shape: f32[8,16,16], index: 1, kind: input, shape index: {}]   ;;  %s3215_s2 = inlined_call_operand.hbm [shape: f32[16,16], index: 2, kind: input, shape index: {}]   ;;  %s3216_s3 = inlined_call_operand.hbm [shape: f32[16,16], index: 3, kind: input, shape index: {}]   ;;  %s3217_s4 = inlined_call_operand.hbm [shape: f32[8,8,128], index: 4, kind: output, shape index: {}]  }
   0x1   :  { %3222 = sst [smem:[#allocation16_spill]] %s3213_s0 }
   0x2   :  { %3223 = sst [smem:[#allocation17_spill]] %s3215_s2 }
   0x3   :  { %3224 = sst [smem:[#allocation18_spill]] %s3216_s3 }
   0x4   :  { %9 = vsyncpa [#allocation3], 0 }
   0x5   :  { %11 = vsyncpa [#allocation3 + $0x1], 0 }
   0x6   :  { %12 = vsyncpa [#allocation6], 0 }
   0x7   :  { %14 = vsyncpa [#allocation6 + $0x1], 0 }
   0x8   :  { %15 = vsyncpa [#allocation9], 0 }
   0x9   :  { %16 = vsyncpa [#allocation4], 0 }
   0xa   :  { %18 = vsyncpa [#allocation4 + $0x1], 0  ;;  %s2752_s15 = smov 0   ;;  %s2754_s16 = smov 0  }
   0xb   :  { %s2756_s17 = smov 0   ;;  %s2758_s18 = smov 0  }
   0xc LB: > { %s2773_s19 = sadd.s32 4294967295, %s2721_s18   ;;  %s2422_s20 = sadd.s32 4294967294, %s2721_s18   ;;  %s2721_s18 = sphi %s2758_s18, %s3238_s18   ;;  %s2717_s17 = sphi %s2756_s17, %s3237_s17   ;;  %s2713_s16 = sphi %s2754_s16, %s3236_s16   ;;  %s2709_s15 = sphi %s2752_s15, %s3235_s15  }
   0xd   : > { %p44_p0 = scmp.ne.s32.totalorder %s2713_s16, %s2709_s15  ;;  %p45_p1 = scmp.eq.s32.totalorder %s2773_s19, 0 }
   0xe   : > { %p136_p2 = scmp.eq.s32.totalorder %s2773_s19, 7  ;;  %p142_p3 = scmp.eq.s32.totalorder %s2422_s20, 7 }
   0xf   : > { %p2782_p4 = por %p45_p1, %p44_p0  ;;  %p2423_p5 = scmp.ge.s32.totalorder %s2721_s18, 1 }
  0x10   : > { %p2787_p6 = por %p142_p3, %p44_p0  ;;  %p149_p7 = scmp.lt.s32.totalorder %s2721_s18, 9 }
  0x11   : > { %s3227_s2 = sld [smem:[#allocation17_spill]]  ;;  %s2723_s27 = smov [#allocation7]  }
  0x12   : > { %p2795_p8 = pnand %p2423_p5, %p149_p7  ;;  %s162_s28 = sshll.u32 %s2723_s27, 4  ;;  %s163_s28 = int_to_ptr.vmem [resolvable:$true] %s162_s28 }
  0x13   : > { %s3229_s3 = sld [smem:[#allocation18_spill]]  ;;  %s3218_s6 = smov 128  }
  0x14   : > { %p2459_p9 = pneg %p2795_p8  ;;  %s3220_s7 = smov 8  }
  0x15   : > { %s2726_s8 = smov [#allocation8]   ;;  %s2813_s10 = sadd.s32 1, %s2721_s18  }
  0x16   : > { %p2460_p10 = pnand %p2459_p9, %p45_p1  ;;  %s176_s9 = sshll.u32 %s2726_s8, 4  ;;  %s177_s9 = int_to_ptr.vmem [resolvable:$true] %s176_s9 }
  0x17   : > { %s160_s25 = sshll.u32 %s3227_s2, 4  ;;  %s31_s11 = sadd.s32 1, %s2717_s17  ;;  %s161_s25 = int_to_ptr.hbm [resolvable:$true] %s160_s25 }
  0x18   : > { %2462 = dma.hbm_to_vmem [thread:$0]  (!%p2460_p10), %s161_s25, 256, %s163_s28, [#allocation6], %s3218_s6, %s3218_s6, %s3220_s7  }
  0x19   : > { %s174_s5 = sshll.u32 %s3229_s3, 4  ;;  %s28_s12 = ssub.s32 %s2721_s18, %s2813_s10  ;;  %s175_s5 = int_to_ptr.hbm [resolvable:$true] %s174_s5 }
  0x1a   : > { %2465 = dma.hbm_to_vmem [thread:$0]  (!%p2460_p10), %s175_s5, 256, %s177_s9, [#allocation9], %s3218_s6, %s3218_s6, %s3220_s7  }
  0x1b   : > { %p38_p11 = scmp.ne.s32.totalorder %s2717_s17, %s2713_s16  ;;  %p29_p12 = scmp.eq.s32.totalorder %s28_s12, 0 }
  0x1c   : > { %p39_p13 = scmp.eq.s32.totalorder %s2721_s18, 0  ;;  %p2479_p3 = scmp.lt.s32.totalorder %s2721_s18, 8 }
  0x1d   : > { %p2823_p0 = por %p136_p2, %p38_p11  ;;  %s190_s20 = sand.u32 1, %s2717_s17  }
  0x1e   : > { %s2829_s14 = scalar_select %p29_p12, %s2717_s17, %s31_s11  }
  0x1f   : > { %p40_p5 = por %p39_p13, %p38_p11  ;;  %s2832_s23 = sshll.u32 %s190_s20, 4 }
  0x20   : > { %s2443_s24 = sshll.u32 %s2721_s18, 4  ;;  %s3231_s0 = sld [smem:[#allocation16_spill]] }
  0x21   : > { %s194_s29 = scalar_lea.vmem [#allocation2], %s2832_s23  ;;  %p2839_p2 = pnand %p2479_p3, %p40_p5 }
  0x22   : > { %s202_s30 = sshll.u32 %s194_s29, 4  ;;  %s221_s12 = scalar_lea.hbm %s3214_s1, %s2443_s24  ;;  %s203_s30 = int_to_ptr.vmem [resolvable:$true] %s202_s30 }
  0x23   : > { %s222_s6 = sshll.u32 %s221_s12, 4  ;;  %s191_s7 = scalar_lea.sflag [#allocation3], %s190_s20  ;;  %s223_s6 = int_to_ptr.hbm [resolvable:$true] %s222_s6 }
  0x24   : > { %p2587_p9 = pneg %p2839_p2 }
  0x26   : > { %s199_s28 = scalar_lea.hbm %s3231_s0, %s2443_s24  ;;  %s2590_s29 = scalar_lea.hbm %s3231_s0, 128 }
  0x27   : > { %s200_s5 = sshll.u32 %s199_s28, 4  ;;  %s201_s5 = int_to_ptr.hbm [resolvable:$true] %s200_s5 }
  0x28   : > { %s2583_s2 = sshra.s32 %s201_s5, 4  ;;  %s2584_s2 = int_to_ptr.hbm [resolvable:$true] %s2583_s2 }
  0x29   : > { %s2585_s25 = scalar_lea.hbm %s2584_s2, 16  ;;  %p2591_p12 = scmp.lt.s32.totalorder %s2584_s2, %s3231_s0 }
  0x2a   : > { %p2586_p7 = scmp.ne.s32.totalorder %s2584_s2, %s2585_s25  ;;  %p2592_p13 = scmp.lt.s32.totalorder %s2590_s29, %s2585_s25 }
  0x2c   : > { %p2588_p10 = pnand %p2587_p9, %p2586_p7  ;;  %p2593_p3 = por %p2592_p13, %p2591_p12 }
  0x2e   : > { %p2589_p11 = pneg %p2588_p10 }
  0x30   : > { %p2594_p5 = pnand %p2593_p3, %p2589_p11 }
  0x32   : > { %2597 = shalt.err (!%p2594_p5)
}
  0x33   : > { %s3233_s20 = smov 8   ;;  %s3234_s24 = smov 128  }
  0x34   : > { %2469 = dma.hbm_to_vmem [thread:$0]  (!%p2839_p2), %s201_s5, 256, %s203_s30, %s191_s7, %s3234_s24, %s3234_s24, %s3233_s20  }
  0x35   : > { %s216_s12 = scalar_lea.vmem [#allocation5], %s2832_s23  ;;  %s212_s28 = sand.u32 1, %s2721_s18  }
  0x36   : > { %s224_s27 = sshll.u32 %s216_s12, 4  ;;  %s213_s9 = scalar_lea.sflag [#allocation6], %s212_s28  ;;  %s225_s27 = int_to_ptr.vmem [resolvable:$true] %s224_s27 }
  0x37   : > { %s2613_s2 = sshra.s32 %s223_s6, 4  ;;  %s2620_s0 = scalar_lea.hbm %s3214_s1, 128  ;;  %s2614_s2 = int_to_ptr.hbm [resolvable:$true] %s2613_s2 }
  0x38   : > { %s2615_s25 = scalar_lea.hbm %s2614_s2, 16  ;;  %p2621_p12 = scmp.lt.s32.totalorder %s2614_s2, %s3214_s1 }
  0x39   : > { %p2616_p7 = scmp.ne.s32.totalorder %s2614_s2, %s2615_s25  ;;  %p2622_p13 = scmp.lt.s32.totalorder %s2620_s0, %s2615_s25 }
  0x3b   : > { %p2618_p10 = pnand %p2616_p7, %p2587_p9  ;;  %p2623_p3 = por %p2622_p13, %p2621_p12 }
  0x3d   : > { %p2619_p11 = pneg %p2618_p10 }
  0x3f   : > { %p2624_p5 = pnand %p2623_p3, %p2619_p11 }
  0x41   : > { %2627 = shalt.err (!%p2624_p5)
}
  0x42   : > { %2472 = dma.hbm_to_vmem [thread:$0]  (!%p2839_p2), %s223_s6, 256, %s225_s27, %s213_s9, %s3234_s24, %s3234_s24, %s3233_s20  }
  0x43   : > { %236 = sbr.rel (%p2795_p8) target bundleno = 1330 (0x532), region = 36  ;;  %s2881_s23 = sand.u32 (!%p2795_p8), 1, %s2713_s16  }
  0x44   : > { %s2434_s3 = sshll.u32 (!%p2795_p8), %s2881_s23, 4  ;;  %s239_s0 = scalar_lea.sflag (!%p2795_p8), [#allocation3], %s2881_s23 }
  0x45   : > { %s242_s30 = scalar_lea.vmem (!%p2795_p8), [#allocation2], %s2434_s3 }
  0x48   : > { %2688 = dma.done.wait (%p2782_p4), %s239_s0, 256  }
  0x49   : > { %2690 = vsyncadd (%p2782_p4), %s239_s0, 4294967040  ;;  %s248_s6 = sand.u32 1, %s2773_s19   ;;  %s2890_s26 = scalar_lea.vmem [#allocation5], %s2434_s3 }
  0x4a   : > { %s249_s5 = scalar_lea.sflag [#allocation6], %s248_s6 }
  0x4b   : > { %2692 = dma.done.wait (%p2782_p4), %s249_s5, 256  }
  0x4c   : > { %2694 = vsyncadd (%p2782_p4), %s249_s5, 4294967040 }
  0x4d   : > { %2696 = dma.done.wait (%p45_p1), [#allocation6], 256  }
  0x4e   : > { %2698 = vsyncadd (%p45_p1), [#allocation6], 4294967040 }
  0x4f   : > { %2700 = dma.done.wait (%p45_p1), [#allocation9], 256  }
  0x50   : > { %2702 = vsyncadd (%p45_p1), [#allocation9], 4294967040  ;;  %vm301_vm0 = vcmask 130048   ;;  %v298_v0 = vld [vmem:[#allocation7 + $0x8] sm:$0xff]  ;;  %v297_v1 = vld [vmem:[#allocation7] sm:$0xff]  ;;  %s2438_s21 = sshll.u32 %s2881_s23, 3 }
  0x51   : > { %v2904_v2 = vld [vmem:[%s242_s30] sm:$0xff]  ;;  %v2906_v3 = vand.u32 4294901760, %v298_v0  ;;  %v2908_v4 = vand.u32 4294901760, %v297_v1  ;;  %v2912_v6 = vld [vmem:[%s242_s30 + $0x8] sm:$0xff]  ;;  %s2440_s8 = sshll.u32 %s2773_s19, 3  ;;  %s292_s27 = scalar_lea.vmem [#allocation10], %s2438_s21 }
  0x52   : > { %v303_v5 = vsel %vm301_vm0, %v2904_v2, 0  ;;  %v306_v8 = vsel %vm301_vm0, %v2912_v6, 0  ;;  %v299_v31 = vld [vmem:[#allocation8] sm:$0xff]  ;;  %v300_v41 = vld [vmem:[#allocation8 + $0x8] sm:$0xff]  ;;  %s2305_s12 = scalar_lea.hbm %s3217_s4, %s2440_s8  ;;  %s2307_s28 = sshll.u32 %s292_s27, 4  ;;  %s2308_s28 = int_to_ptr.vmem [resolvable:$true] %s2307_s28 }
  0x53   : > { %v326_v7 = vand.u32 4294901760, %v303_v5  ;;  %v2917_v9 = vsub.f32 %v298_v0, %v2906_v3  ;;  %323 = vmatpush.msra.mxu0 %v2906_v3  ;;  %v2921_v10 = vsub.f32 %v297_v1, %v2908_v4  ;;  %424 = vmatpush.msra.mxu3 %v2906_v3  ;;  %v334_v11 = vand.u32 4294901760, %v306_v8  ;;  %v2961_v55 = vld [vmem:[%s2890_s26] sm:$0xff]  ;;  %s2309_s9 = sshll.u32 %s2305_s12, 4  ;;  %s2295_s2 = scalar_lea.sflag [#allocation4], %s2881_s23  ;;  %s2310_s9 = int_to_ptr.hbm [resolvable:$true] %s2309_s9 }
  0x54   : > { %v499_v35 = vsel %vm301_vm0, %v299_v31, 0  ;;  %v502_v47 = vsel %vm301_vm0, %v300_v41, 0  ;;  %v695_v62 = vsel %vm301_vm0, %v2961_v55, 0  ;;  %s2657_s25 = sshra.s32 %s2310_s9, 4  ;;  %s2663_s7 = scalar_lea.hbm %s3217_s4, 64  ;;  %s2658_s25 = int_to_ptr.hbm [resolvable:$true] %s2657_s25 }
  0x55   : > { %v327_v12 = vsub.f32 %v303_v5, %v326_v7  ;;  %394 = vmatpush.msra.mxu2 %v2917_v9  ;;  %325 = vmatpush.msra.mxu0 %v2908_v4  ;;  %v2927_v13 = vand.u32 4294901760, %v2917_v9  ;;  %v2930_v14 = vand.u32 4294901760, %v2921_v10  ;;  %v335_v15 = vsub.f32 %v306_v8, %v334_v11  ;;  %s2659_s19 = scalar_lea.hbm %s2658_s25, 8  ;;  %p2664_p2 = scmp.lt.s32.totalorder %s2658_s25, %s3217_s4 }
  0x56   : > { %426 = vmatpush.msra.mxu3 %v2908_v4  ;;  %v2949_v36 = vand.u32 4294901760, %v499_v35  ;;  %v2958_v50 = vand.u32 4294901760, %v502_v47  ;;  %p2660_p1 = scmp.ne.s32.totalorder %s2658_s25, %s2659_s19  ;;  %p2665_p9 = scmp.lt.s32.totalorder %s2663_s7, %s2659_s19 }
  0x57   : > { %v328_v16 = vand.u32 4294901760, %v327_v12  ;;  %397 = vmatpush.msra.mxu2 %v2921_v10  ;;  %v360_v17 = vsub.f32 %v2917_v9, %v2927_v13  ;;  %v366_v18 = vsub.f32 %v2921_v10, %v2930_v14  ;;  %457 = vmatpush.msrb.mxu0 %v2927_v13  ;;  %v336_v20 = vand.u32 4294901760, %v335_v15 }
  0x58   : > { %400 = vmatmul.f32.vlgmr.msra.gmra.mxu2 %v327_v12  ;;  %v2952_v44 = vsub.f32 %v499_v35, %v2949_v36  ;;  %v2966_v58 = vsub.f32 %v502_v47, %v2958_v50  ;;  %p2661_p4 = pnand %p2660_p1, %p2823_p0  ;;  %p2666_p7 = por %p2665_p9, %p2664_p2 }
  0x59   : > { %v329_v19 = vsub.f32 %v327_v12, %v328_v16  ;;  %430 = vmatmul.f32.vlgmr.msra.gmra.mxu3 %v328_v16  ;;  %v2939_v21 = vand.u32 4294901760, %v360_v17  ;;  %v2941_v22 = vand.u32 4294901760, %v366_v18  ;;  %461 = vmatpush.msrb.mxu0 %v2930_v14  ;;  %v337_v24 = vsub.f32 %v335_v15, %v336_v20 }
  0x5a   : > { %v2956_v49 = vand.u32 4294901760, %v2952_v44  ;;  %v2973_v0 = vand.u32 4294901760, %v2966_v58  ;;  %p2662_p8 = pneg %p2661_p4 }
  0x5b   : > { %v330_v23 = vand.u32 4294901760, %v329_v19  ;;  %362 = vmatpush.msra.mxu1 %v2939_v21  ;;  %v338_v25 = vand.u32 4294901760, %v337_v24 }
  0x5c   : > { %v525_v57 = vsub.f32 %v2952_v44, %v2956_v49  ;;  %v533_v12 = vsub.f32 %v2966_v58, %v2973_v0  ;;  %p2667_p10 = pnand %p2666_p7, %p2662_p8 }
  0x5d   : > { %331 = vmatmul.f32.vlgmr.msra.gmra.mxu0 %v330_v23  ;;  %368 = vmatpush.msra.mxu1 %v2941_v22 }
  0x5e   : > { %370 = vmatmul.f32.vlgmr.msra.gmra.mxu1 %v326_v7  ;;  %v2970_v63 = vand.u32 4294901760, %v525_v57 }
  0x5f   : > { %486 = vmatpush.msrb.mxu1 %v2906_v3 }
  0x60   : > { %405 = vmatmul.f32.gmra.mxu2 %v335_v15 }
  0x61   : > { %436 = vmatmul.f32.gmra.mxu3 %v336_v20  ;;  %488 = vmatpush.msrb.mxu1 %v2908_v4  ;;  %v2986_v20 = vand.u32 4294901760, %v533_v12 }
  0x65   : > { %339 = vmatmul.f32.gmra.mxu0 %v338_v25 }
  0x66   : > { %374 = vmatmul.f32.gmra.mxu1 %v334_v11 }
  0x6d   : > { %463 = vmatmul.f32.vlgmr.msrb.gmra.mxu0 %v326_v7 }
  0x6e   : > { %490 = vmatmul.f32.vlgmr.msrb.gmra.mxu1 %v326_v7  ;;  %v718_v7 = vand.u32 4294901760, %v695_v62 }
  0x70   : > { %v719_v17 = vsub.f32 %v695_v62, %v718_v7 }
  0x72   : > { %v720_v24 = vand.u32 4294901760, %v719_v17 }
  0x75   : > { %467 = vmatmul.f32.gmra.mxu0 %v334_v11 }
  0x76   : > { %494 = vmatmul.f32.gmra.mxu1 %v334_v11  ;;  %v2976_v11 = vld [vmem:[%s2890_s26 + $0x8] sm:$0xff] }
  0x77   : > { %v698_v19 = vsel %vm301_vm0, %v2976_v11, 0 }
  0x78   : > { %v726_v25 = vand.u32 4294901760, %v698_v19 }
  0xda   : > { %v332_v26 = vpop.f32.mrf.mxu0 }
  0xdb   : > { %v371_v27 = vpop.f32.mrf.mxu1  ;;  %v401_v28 = vpop.f32.mrf.mxu2 }
  0xdc   : > { %v372_v29 = vadd.f32 %v371_v27, %v332_v26  ;;  %v431_v32 = vpop.f32.mrf.mxu3  ;;  %v721_v26 = vsub.f32 %v719_v17, %v720_v24  ;;  %v727_v27 = vsub.f32 %v698_v19, %v726_v25 }
  0xde   : > { %v402_v34 = vadd.f32 %v401_v28, %v372_v29  ;;  %v722_v28 = vand.u32 4294901760, %v721_v26  ;;  %v728_v29 = vand.u32 4294901760, %v727_v27 }
  0xe0   : > { %v432_v37 = vadd.f32 %v431_v32, %v402_v34 }
  0xe2   : > { %v340_v30 = vpop.f32.mrf.mxu0 }
  0xe3   : > { %v375_v33 = vpop.f32.mrf.mxu1  ;;  %v406_v39 = vpop.f32.mrf.mxu2 }
  0xe4   : > { %v376_v38 = vadd.f32 %v375_v33, %v340_v30  ;;  %v437_v48 = vpop.f32.mrf.mxu3  ;;  %v729_v30 = vsub.f32 %v727_v27, %v728_v29 }
  0xe6   : > { %v407_v45 = vadd.f32 %v406_v39, %v376_v38  ;;  %v730_v31 = vand.u32 4294901760, %v729_v30 }
  0xe8   : > { %v438_v51 = vadd.f32 %v437_v48, %v407_v45 }
  0xea   : > { %v464_v40 = vpop.f32.mrf.mxu0 }
  0xeb   : > { %v465_v42 = vadd.f32 %v464_v40, %v432_v37  ;;  %v491_v43 = vpop.f32.mrf.mxu1 }
  0xed   : > { %v492_v46 = vadd.f32 %v491_v43, %v465_v42 }
  0xef   : > { %v520_v52 = vand.u32 4294901760, %v492_v46 }
  0xf1   : > { %v560_v59 = vsub.f32 %v492_v46, %v520_v52 }
  0xf2   : > { %v468_v53 = vpop.f32.mrf.mxu0 }
  0xf3   : > { %v469_v54 = vadd.f32 %v468_v53, %v438_v51  ;;  %v495_v56 = vpop.f32.mrf.mxu1  ;;  %v561_v5 = vand.u32 4294901760, %v560_v59 }
  0xf5   : > { %v496_v60 = vadd.f32 %v495_v56, %v469_v54  ;;  %v562_v16 = vsub.f32 %v560_v59, %v561_v5 }
  0xf7   : > { %v518_v61 = vand.u32 4294901760, %v496_v60  ;;  %v563_v23 = vand.u32 4294901760, %v562_v16 }
  0xf9   : > { %v554_v1 = vsub.f32 %v496_v60, %v518_v61  ;;  %519 = vmatpush.msrb.mxu2 %v518_v61  ;;  %620 = vmatpush.msra.mxu1 %v518_v61 }
  0xfb   : > { %521 = vmatpush.msrb.mxu2 %v520_v52  ;;  %590 = vmatpush.msra.mxu0 %v554_v1  ;;  %v555_v8 = vand.u32 4294901760, %v554_v1 }
  0xfc   : > { %622 = vmatpush.msra.mxu1 %v520_v52  ;;  %527 = vmatmul.f32.vlgmr.msrb.gmra.mxu2 %v2970_v63 }
  0xfd   : > { %593 = vmatpush.msra.mxu0 %v560_v59  ;;  %653 = vmatpush.msra.mxu2 %v555_v8  ;;  %v556_v15 = vsub.f32 %v554_v1, %v555_v8 }
  0xfe   : > { %596 = vmatmul.f32.vlgmr.msra.gmra.mxu0 %v2952_v44  ;;  %626 = vmatmul.f32.vlgmr.msra.gmra.mxu1 %v2956_v49 }
  0xff   : > { %657 = vmatpush.msra.mxu2 %v561_v5  ;;  %v557_v18 = vand.u32 4294901760, %v556_v15  ;;  %715 = vmatpush.msrb.mxu0 %v2906_v3 }
 0x100   : > { %754 = vmatpush.msrb.mxu1 %v2939_v21 }
 0x101   : > { %786 = vmatpush.msrb.mxu2 %v2917_v9  ;;  %558 = vmatpush.msrb.mxu3 %v557_v18  ;;  %v1080_v18 = vmul.f32 %v2904_v2, %v2904_v2 }
 0x102   : > { %717 = vmatpush.msrb.mxu0 %v2908_v4  ;;  %760 = vmatpush.msrb.mxu1 %v2941_v22 }
 0x103   : > { %789 = vmatpush.msrb.mxu2 %v2921_v10  ;;  %564 = vmatpush.msrb.mxu3 %v563_v23 }
 0x104   : > { %849 = vmatpush.msra.mxu0 %v2927_v13  ;;  %535 = vmatmul.f32.gmra.mxu2 %v2986_v20 }
 0x105   : > { %566 = vmatmul.f32.vlgmr.msrb.gmra.mxu3 %v2949_v36  ;;  %878 = vmatpush.msra.mxu1 %v2906_v3 }
 0x106   : > { %682 = vmatpush.msra.mxu3 %v518_v61  ;;  %853 = vmatpush.msra.mxu0 %v2930_v14 }
 0x107   : > { %601 = vmatmul.f32.gmra.mxu0 %v2966_v58  ;;  %632 = vmatmul.f32.gmra.mxu1 %v2973_v0 }
 0x108   : > { %684 = vmatpush.msra.mxu3 %v520_v52  ;;  %880 = vmatpush.msra.mxu1 %v2908_v4 }
 0x10a   : > { %816 = vmatpush.msrb.mxu3 %v2906_v3 }
 0x10c   : > { %818 = vmatpush.msrb.mxu3 %v2908_v4  ;;  %659 = vmatmul.f32.vlgmr.msra.gmra.mxu2 %v2949_v36 }
 0x10d   : > { %570 = vmatmul.f32.gmra.mxu3 %v2958_v50 }
 0x10f   : > { %723 = vmatmul.f32.vlgmr.msrb.gmra.mxu0 %v722_v28  ;;  %762 = vmatmul.f32.vlgmr.msrb.gmra.mxu1 %v718_v7 }
 0x114   : > { %663 = vmatmul.f32.gmra.mxu2 %v2958_v50 }
 0x115   : > { %686 = vmatmul.f32.vlgmr.msra.gmra.mxu3 %v2949_v36 }
 0x117   : > { %731 = vmatmul.f32.gmra.mxu0 %v730_v31  ;;  %766 = vmatmul.f32.gmra.mxu1 %v726_v25  ;;  %v1081_v31 = vmul.f32 %v2912_v6, %v2912_v6 }
 0x11c   : > { %792 = vmatmul.f32.vlgmr.msrb.gmra.mxu2 %v719_v17 }
 0x11d   : > { %690 = vmatmul.f32.gmra.mxu3 %v2958_v50 }
 0x11f   : > { %855 = vmatmul.f32.vlgmr.msra.gmra.mxu0 %v718_v7  ;;  %882 = vmatmul.f32.vlgmr.msra.gmra.mxu1 %v718_v7 }
 0x124   : > { %797 = vmatmul.f32.gmra.mxu2 %v727_v27 }
 0x125   : > { %822 = vmatmul.f32.vlgmr.msrb.gmra.mxu3 %v720_v24 }
 0x127   : > { %859 = vmatmul.f32.gmra.mxu0 %v726_v25  ;;  %886 = vmatmul.f32.gmra.mxu1 %v726_v25  ;;  %v1083_v25 = vsel %vm301_vm0, %v1080_v18, 0 }
 0x12d   : > { %828 = vmatmul.f32.gmra.mxu3 %v728_v29  ;;  %v1106_v29 = vand.u32 4294901760, %v1083_v25 }
 0x17b   : > { %v3008_v32 = vpop.f32.mrf.mxu0  ;;  %v3012_v34 = vpop.f32.mrf.mxu1 }
 0x17f   : > { %v3010_v33 = vpop.f32.mrf.mxu2 }
 0x184   : > { %v3014_v35 = vpop.f32.mrf.mxu0  ;;  %v3020_v39 = vpop.f32.mrf.mxu1 }
 0x187   : > { %v3016_v37 = vpop.f32.mrf.mxu2 }
 0x188   : > { %v3018_v38 = vpop.f32.mrf.mxu3 }
 0x18c   : > { %v724_v42 = vpop.f32.mrf.mxu0  ;;  %v763_v43 = vpop.f32.mrf.mxu1 }
 0x18d   : > { %v764_v53 = vadd.f32 %v763_v43, %v724_v42 }
 0x18f   : > { %v3024_v41 = vpop.f32.mrf.mxu2 }
 0x190   : > { %v3022_v40 = vpop.f32.mrf.mxu3 }
 0x194   : > { %v732_v47 = vpop.f32.mrf.mxu0  ;;  %v767_v51 = vpop.f32.mrf.mxu1 }
 0x195   : > { %v768_v1 = vadd.f32 %v767_v51, %v732_v47  ;;  %v1107_v47 = vsub.f32 %v1083_v25, %v1106_v29 }
 0x197   : > { %v3026_v45 = vpop.f32.mrf.mxu2 }
 0x198   : > { %v3028_v46 = vpop.f32.mrf.mxu3 }
 0x19c   : > { %v856_v54 = vpop.f32.mrf.mxu0  ;;  %v883_v59 = vpop.f32.mrf.mxu1 }
 0x19f   : > { %v793_v52 = vpop.f32.mrf.mxu2 }
 0x1a0   : > { %v3030_v48 = vpop.f32.mrf.mxu3  ;;  %v794_v56 = vadd.f32 %v793_v52, %v764_v53  ;;  %v1086_v52 = vsel %vm301_vm0, %v1081_v31, 0 }
 0x1a4   : > { %v860_v12 = vpop.f32.mrf.mxu0  ;;  %v887_v17 = vpop.f32.mrf.mxu1 }
 0x1a7   : > { %v798_v62 = vpop.f32.mrf.mxu2 }
 0x1a8   : > { %v823_v57 = vpop.f32.mrf.mxu3  ;;  %v799_v7 = vadd.f32 %v798_v62, %v768_v1 }
 0x1a9   : > { %v824_v60 = vadd.f32 %v823_v57, %v794_v56  ;;  %v1114_v56 = vand.u32 4294901760, %v1086_v52 }
 0x1ab   : > { %v857_v61 = vadd.f32 %v856_v54, %v824_v60  ;;  %v1108_v54 = vand.u32 4294901760, %v1107_v47 }
 0x1ad   : > { %v884_v5 = vadd.f32 %v883_v59, %v857_v61  ;;  %v1109_v57 = vsub.f32 %v1107_v47, %v1108_v54  ;;  %v1115_v59 = vsub.f32 %v1086_v52, %v1114_v56 }
 0x1af   : > { %v906_v15 = vand.u32 4294901760, %v884_v5  ;;  %v1110_v60 = vand.u32 4294901760, %v1109_v57  ;;  %v1116_v61 = vand.u32 4294901760, %v1115_v59 }
 0x1b0   : > { %v829_v8 = vpop.f32.mrf.mxu3 }
 0x1b1   : > { %v830_v16 = vadd.f32 %v829_v8, %v799_v7  ;;  %v946_v23 = vsub.f32 %v884_v5, %v906_v15  ;;  %v1117_v62 = vsub.f32 %v1115_v59, %v1116_v61 }
 0x1b3   : > { %v861_v19 = vadd.f32 %v860_v12, %v830_v16  ;;  %v947_v28 = vand.u32 4294901760, %v946_v23  ;;  %v1118_v1 = vand.u32 4294901760, %v1117_v62 }
 0x1b5   : > { %v888_v24 = vadd.f32 %v887_v17, %v861_v19  ;;  %v948_v43 = vsub.f32 %v946_v23, %v947_v28 }
 0x1b7   : > { %v904_v26 = vand.u32 4294901760, %v888_v24  ;;  %v949_v53 = vand.u32 4294901760, %v948_v43 }
 0x1b9   : > { %v940_v27 = vsub.f32 %v888_v24, %v904_v26  ;;  %905 = vmatpush.msra.mxu2 %v904_v26  ;;  %1006 = vmatpush.msrb.mxu1 %v904_v26 }
 0x1bb   : > { %v941_v30 = vand.u32 4294901760, %v940_v27  ;;  %907 = vmatpush.msra.mxu2 %v906_v15  ;;  %976 = vmatpush.msrb.mxu0 %v940_v27 }
 0x1bc   : > { %1008 = vmatpush.msrb.mxu1 %v906_v15  ;;  %913 = vmatmul.f32.vlgmr.msra.gmra.mxu2 %v2970_v63 }
 0x1bd   : > { %v942_v42 = vsub.f32 %v940_v27, %v941_v30  ;;  %979 = vmatpush.msrb.mxu0 %v946_v23  ;;  %1039 = vmatpush.msrb.mxu2 %v941_v30 }
 0x1be   : > { %982 = vmatmul.f32.vlgmr.msrb.gmra.mxu0 %v2952_v44  ;;  %1012 = vmatmul.f32.vlgmr.msrb.gmra.mxu1 %v2956_v49 }
 0x1bf   : > { %1043 = vmatpush.msrb.mxu2 %v947_v28  ;;  %v943_v51 = vand.u32 4294901760, %v942_v42  ;;  %1103 = vmatpush.msra.mxu0 %v2906_v3 }
 0x1c0   : > { %1142 = vmatpush.msra.mxu1 %v2939_v21 }
 0x1c1   : > { %1174 = vmatpush.msra.mxu2 %v2917_v9  ;;  %944 = vmatpush.msra.mxu3 %v943_v51 }
 0x1c2   : > { %1105 = vmatpush.msra.mxu0 %v2908_v4  ;;  %1148 = vmatpush.msra.mxu1 %v2941_v22 }
 0x1c3   : > { %1177 = vmatpush.msra.mxu2 %v2921_v10  ;;  %950 = vmatpush.msra.mxu3 %v949_v53 }
 0x1c4   : > { %1237 = vmatpush.msrb.mxu0 %v2927_v13  ;;  %921 = vmatmul.f32.gmra.mxu2 %v2986_v20 }
 0x1c5   : > { %952 = vmatmul.f32.vlgmr.msra.gmra.mxu3 %v2949_v36  ;;  %1266 = vmatpush.msrb.mxu1 %v2906_v3 }
 0x1c6   : > { %1068 = vmatpush.msrb.mxu3 %v904_v26  ;;  %1241 = vmatpush.msrb.mxu0 %v2930_v14 }
 0x1c7   : > { %987 = vmatmul.f32.gmra.mxu0 %v2966_v58  ;;  %1018 = vmatmul.f32.gmra.mxu1 %v2973_v0 }
 0x1c8   : > { %1070 = vmatpush.msrb.mxu3 %v906_v15  ;;  %1268 = vmatpush.msrb.mxu1 %v2908_v4 }
 0x1ca   : > { %1204 = vmatpush.msra.mxu3 %v2906_v3 }
 0x1cc   : > { %1206 = vmatpush.msra.mxu3 %v2908_v4  ;;  %1045 = vmatmul.f32.vlgmr.msrb.gmra.mxu2 %v2949_v36 }
 0x1cd   : > { %956 = vmatmul.f32.gmra.mxu3 %v2958_v50 }
 0x1cf   : > { %1111 = vmatmul.f32.vlgmr.msra.gmra.mxu0 %v1110_v60  ;;  %1150 = vmatmul.f32.vlgmr.msra.gmra.mxu1 %v1106_v29 }
 0x1d4   : > { %1049 = vmatmul.f32.gmra.mxu2 %v2958_v50 }
 0x1d5   : > { %1072 = vmatmul.f32.vlgmr.msrb.gmra.mxu3 %v2949_v36 }
 0x1d7   : > { %1119 = vmatmul.f32.gmra.mxu0 %v1118_v1  ;;  %1154 = vmatmul.f32.gmra.mxu1 %v1114_v56 }
 0x1dc   : > { %1180 = vmatmul.f32.vlgmr.msra.gmra.mxu2 %v1107_v47 }
 0x1dd   : > { %1076 = vmatmul.f32.gmra.mxu3 %v2958_v50 }
 0x1df   : > { %1243 = vmatmul.f32.vlgmr.msrb.gmra.mxu0 %v1106_v29  ;;  %1270 = vmatmul.f32.vlgmr.msrb.gmra.mxu1 %v1106_v29 }
 0x1e4   : > { %1185 = vmatmul.f32.gmra.mxu2 %v1115_v59 }
 0x1e5   : > { %1210 = vmatmul.f32.vlgmr.msra.gmra.mxu3 %v1108_v54 }
 0x1e7   : > { %1247 = vmatmul.f32.gmra.mxu0 %v1114_v56  ;;  %1274 = vmatmul.f32.gmra.mxu1 %v1114_v56 }
 0x1ed   : > { %1216 = vmatmul.f32.gmra.mxu3 %v1116_v61 }
 0x23b   : > { %v983_v5 = vpop.f32.mrf.mxu0  ;;  %v1013_v8 = vpop.f32.mrf.mxu1 }
 0x23f   : > { %v914_v7 = vpop.f32.mrf.mxu2 }
 0x244   : > { %v988_v12 = vpop.f32.mrf.mxu0  ;;  %v1019_v19 = vpop.f32.mrf.mxu1 }
 0x247   : > { %v922_v15 = vpop.f32.mrf.mxu2 }
 0x248   : > { %v953_v16 = vpop.f32.mrf.mxu3 }
 0x249   : > { %v954_v17 = vadd.f32 %v953_v16, %v914_v7 }
 0x24b   : > { %v984_v18 = vadd.f32 %v983_v5, %v954_v17 }
 0x24c   : > { %v1112_v28 = vpop.f32.mrf.mxu0  ;;  %v1151_v31 = vpop.f32.mrf.mxu1 }
 0x24d   : > { %v1014_v23 = vadd.f32 %v1013_v8, %v984_v18  ;;  %v1152_v59 = vadd.f32 %v1151_v31, %v1112_v28 }
 0x24f   : > { %v1046_v25 = vpop.f32.mrf.mxu2 }
 0x250   : > { %v957_v24 = vpop.f32.mrf.mxu3  ;;  %v1047_v27 = vadd.f32 %v1046_v25, %v1014_v23  ;;  %v1468_v25 = vmul.f32 %v2961_v55, %v2961_v55 }
 0x251   : > { %v958_v26 = vadd.f32 %v957_v24, %v922_v15 }
 0x253   : > { %v989_v29 = vadd.f32 %v988_v12, %v958_v26 }
 0x254   : > { %v1120_v52 = vpop.f32.mrf.mxu0  ;;  %v1155_v54 = vpop.f32.mrf.mxu1 }
 0x255   : > { %v1020_v30 = vadd.f32 %v1019_v19, %v989_v29  ;;  %v1156_v12 = vadd.f32 %v1155_v54, %v1120_v52  ;;  %v1469_v52 = vmul.f32 %v2976_v11, %v2976_v11 }
 0x257   : > { %v1050_v42 = vpop.f32.mrf.mxu2 }
 0x258   : > { %v1073_v43 = vpop.f32.mrf.mxu3  ;;  %v1051_v47 = vadd.f32 %v1050_v42, %v1020_v30  ;;  %v1471_v30 = vsel %vm301_vm0, %v1468_v25, 0 }
 0x259   : > { %v3062_v51 = vadd.f32 %v1073_v43, %v1047_v27  ;;  %v1494_v43 = vand.u32 4294901760, %v1471_v30 }
 0x25c   : > { %v1244_v60 = vpop.f32.mrf.mxu0  ;;  %v1271_v1 = vpop.f32.mrf.mxu1 }
 0x25f   : > { %v1181_v57 = vpop.f32.mrf.mxu2 }
 0x260   : > { %v1077_v53 = vpop.f32.mrf.mxu3  ;;  %v1182_v61 = vadd.f32 %v1181_v57, %v1152_v59  ;;  %v1495_v57 = vsub.f32 %v1471_v30, %v1494_v43 }
 0x261   : > { %v3064_v56 = vadd.f32 %v1077_v53, %v1051_v47 }
 0x264   : > { %v1248_v18 = vpop.f32.mrf.mxu0  ;;  %v1275_v24 = vpop.f32.mrf.mxu1 }
 0x267   : > { %v1186_v8 = vpop.f32.mrf.mxu2 }
 0x268   : > { %v1211_v62 = vpop.f32.mrf.mxu3  ;;  %v1187_v16 = vadd.f32 %v1186_v8, %v1156_v12 }
 0x269   : > { %v1212_v5 = vadd.f32 %v1211_v62, %v1182_v61  ;;  %v1496_v62 = vand.u32 4294901760, %v1495_v57 }
 0x26b   : > { %v1245_v7 = vadd.f32 %v1244_v60, %v1212_v5  ;;  %v1474_v60 = vsel %vm301_vm0, %v1469_v52, 0  ;;  %v1497_v5 = vsub.f32 %v1495_v57, %v1496_v62 }
 0x26d   : > { %v1272_v15 = vadd.f32 %v1271_v1, %v1245_v7  ;;  %v1502_v1 = vand.u32 4294901760, %v1474_v60  ;;  %v1498_v8 = vand.u32 4294901760, %v1497_v5 }
 0x26f   : > { %v1294_v19 = vand.u32 4294901760, %v1272_v15  ;;  %v1503_v7 = vsub.f32 %v1474_v60, %v1502_v1 }
 0x270   : > { %v1217_v17 = vpop.f32.mrf.mxu3 }
 0x271   : > { %v1218_v23 = vadd.f32 %v1217_v17, %v1187_v16  ;;  %v1334_v27 = vsub.f32 %v1272_v15, %v1294_v19  ;;  %v1504_v12 = vand.u32 4294901760, %v1503_v7 }
 0x273   : > { %v1249_v26 = vadd.f32 %v1248_v18, %v1218_v23  ;;  %v1335_v42 = vand.u32 4294901760, %v1334_v27  ;;  %v1505_v15 = vsub.f32 %v1503_v7, %v1504_v12 }
 0x275   : > { %v1276_v28 = vadd.f32 %v1275_v24, %v1249_v26  ;;  %v1336_v54 = vsub.f32 %v1334_v27, %v1335_v42  ;;  %v1506_v16 = vand.u32 4294901760, %v1505_v15 }
 0x277   : > { %v1292_v29 = vand.u32 4294901760, %v1276_v28  ;;  %v1337_v61 = vand.u32 4294901760, %v1336_v54 }
 0x279   : > { %v1328_v31 = vsub.f32 %v1276_v28, %v1292_v29  ;;  %1293 = vmatpush.msrb.mxu2 %v1292_v29  ;;  %1394 = vmatpush.msra.mxu1 %v1292_v29 }
 0x27b   : > { %v1329_v47 = vand.u32 4294901760, %v1328_v31  ;;  %1295 = vmatpush.msrb.mxu2 %v1294_v19  ;;  %1364 = vmatpush.msra.mxu0 %v1328_v31 }
 0x27c   : > { %1396 = vmatpush.msra.mxu1 %v1294_v19  ;;  %1301 = vmatmul.f32.vlgmr.msrb.gmra.mxu2 %v2970_v63 }
 0x27d   : > { %v1330_v53 = vsub.f32 %v1328_v31, %v1329_v47  ;;  %1367 = vmatpush.msra.mxu0 %v1334_v27  ;;  %1427 = vmatpush.msra.mxu2 %v1329_v47 }
 0x27e   : > { %1370 = vmatmul.f32.vlgmr.msra.gmra.mxu0 %v2952_v44  ;;  %1400 = vmatmul.f32.vlgmr.msra.gmra.mxu1 %v2956_v49 }
 0x27f   : > { %1431 = vmatpush.msra.mxu2 %v1335_v42  ;;  %v1331_v59 = vand.u32 4294901760, %v1330_v53  ;;  %1491 = vmatpush.msrb.mxu0 %v2906_v3 }
 0x280   : > { %1530 = vmatpush.msrb.mxu1 %v2939_v21 }
 0x281   : > { %1562 = vmatpush.msrb.mxu2 %v2917_v9  ;;  %1332 = vmatpush.msrb.mxu3 %v1331_v59 }
 0x282   : > { %1493 = vmatpush.msrb.mxu0 %v2908_v4  ;;  %1536 = vmatpush.msrb.mxu1 %v2941_v22 }
 0x283   : > { %1565 = vmatpush.msrb.mxu2 %v2921_v10  ;;  %1338 = vmatpush.msrb.mxu3 %v1337_v61 }
 0x284   : > { %1625 = vmatpush.msra.mxu0 %v2927_v13  ;;  %1309 = vmatmul.f32.gmra.mxu2 %v2986_v20 }
 0x285   : > { %1340 = vmatmul.f32.vlgmr.msrb.gmra.mxu3 %v2949_v36  ;;  %1654 = vmatpush.msra.mxu1 %v2906_v3 }
 0x286   : > { %1456 = vmatpush.msra.mxu3 %v1292_v29  ;;  %1629 = vmatpush.msra.mxu0 %v2930_v14 }
 0x287   : > { %1375 = vmatmul.f32.gmra.mxu0 %v2966_v58  ;;  %1406 = vmatmul.f32.gmra.mxu1 %v2973_v0 }
 0x288   : > { %1458 = vmatpush.msra.mxu3 %v1294_v19  ;;  %1656 = vmatpush.msra.mxu1 %v2908_v4 }
 0x28a   : > { %1592 = vmatpush.msrb.mxu3 %v2906_v3 }
 0x28c   : > { %1594 = vmatpush.msrb.mxu3 %v2908_v4  ;;  %1433 = vmatmul.f32.vlgmr.msra.gmra.mxu2 %v2949_v36 }
 0x28d   : > { %1344 = vmatmul.f32.gmra.mxu3 %v2958_v50 }
 0x28f   : > { %1499 = vmatmul.f32.vlgmr.msrb.gmra.mxu0 %v1498_v8  ;;  %1538 = vmatmul.f32.vlgmr.msrb.gmra.mxu1 %v1494_v43 }
 0x294   : > { %1437 = vmatmul.f32.gmra.mxu2 %v2958_v50 }
 0x295   : > { %1460 = vmatmul.f32.vlgmr.msra.gmra.mxu3 %v2949_v36 }
 0x297   : > { %1507 = vmatmul.f32.gmra.mxu0 %v1506_v16  ;;  %1542 = vmatmul.f32.gmra.mxu1 %v1502_v1 }
 0x29c   : > { %1568 = vmatmul.f32.vlgmr.msrb.gmra.mxu2 %v1495_v57 }
 0x29d   : > { %1464 = vmatmul.f32.gmra.mxu3 %v2958_v50 }
 0x29f   : > { %1631 = vmatmul.f32.vlgmr.msra.gmra.mxu0 %v1494_v43  ;;  %1658 = vmatmul.f32.vlgmr.msra.gmra.mxu1 %v1494_v43 }
 0x2a4   : > { %1573 = vmatmul.f32.gmra.mxu2 %v1503_v7 }
 0x2a5   : > { %1598 = vmatmul.f32.vlgmr.msrb.gmra.mxu3 %v1496_v62 }
 0x2a7   : > { %1635 = vmatmul.f32.gmra.mxu0 %v1502_v1  ;;  %1662 = vmatmul.f32.gmra.mxu1 %v1502_v1 }
 0x2ad   : > { %1604 = vmatmul.f32.gmra.mxu3 %v1504_v12 }
 0x2fb   : > { %v1371_v17 = vpop.f32.mrf.mxu0  ;;  %v1401_v19 = vpop.f32.mrf.mxu1 }
 0x2ff   : > { %v1302_v18 = vpop.f32.mrf.mxu2 }
 0x304   : > { %v1376_v23 = vpop.f32.mrf.mxu0  ;;  %v1407_v28 = vpop.f32.mrf.mxu1 }
 0x307   : > { %v1310_v24 = vpop.f32.mrf.mxu2 }
 0x308   : > { %v1341_v25 = vpop.f32.mrf.mxu3 }
 0x309   : > { %v1342_v26 = vadd.f32 %v1341_v25, %v1302_v18 }
 0x30b   : > { %v1372_v27 = vadd.f32 %v1371_v17, %v1342_v26 }
 0x30c   : > { %v1500_v43 = vpop.f32.mrf.mxu0  ;;  %v1539_v54 = vpop.f32.mrf.mxu1 }
 0x30d   : > { %v1402_v29 = vadd.f32 %v1401_v19, %v1372_v27  ;;  %v1540_v12 = vadd.f32 %v1539_v54, %v1500_v43 }
 0x30f   : > { %v1434_v31 = vpop.f32.mrf.mxu2 }
 0x310   : > { %v1345_v30 = vpop.f32.mrf.mxu3  ;;  %v1435_v47 = vadd.f32 %v1434_v31, %v1402_v29 }
 0x311   : > { %v1346_v42 = vadd.f32 %v1345_v30, %v1310_v24 }
 0x313   : > { %v1377_v52 = vadd.f32 %v1376_v23, %v1346_v42 }
 0x314   : > { %v1508_v62 = vpop.f32.mrf.mxu0  ;;  %v1543_v5 = vpop.f32.mrf.mxu1 }
 0x315   : > { %v1408_v53 = vadd.f32 %v1407_v28, %v1377_v52  ;;  %v1544_v25 = vadd.f32 %v1543_v5, %v1508_v62 }
 0x317   : > { %v1438_v57 = vpop.f32.mrf.mxu2 }
 0x318   : > { %v1461_v59 = vpop.f32.mrf.mxu3  ;;  %v1439_v60 = vadd.f32 %v1438_v57, %v1408_v53 }
 0x319   : > { %v3096_v61 = vadd.f32 %v1461_v59, %v1435_v47  ;;  %v1856_v47 = vmul.f32 %v2961_v55, %v2904_v2 }
 0x31b   : > { %v1859_v54 = vsel %vm301_vm0, %v1856_v47, 0  ;;  %v572_v47 = vadd.f32 %v3022_v40, %v3016_v37 }
 0x31c   : > { %v1632_v15 = vpop.f32.mrf.mxu0  ;;  %v1659_v18 = vpop.f32.mrf.mxu1  ;;  %v1882_v62 = vand.u32 4294901760, %v1859_v54 }
 0x31f   : > { %v1569_v8 = vpop.f32.mrf.mxu2 }
 0x320   : > { %v1465_v1 = vpop.f32.mrf.mxu3  ;;  %v1570_v16 = vadd.f32 %v1569_v8, %v1540_v12  ;;  %v1883_v8 = vsub.f32 %v1859_v54, %v1882_v62 }
 0x321   : > { %v3098_v7 = vadd.f32 %v1465_v1, %v1439_v60  ;;  %v1857_v1 = vmul.f32 %v2976_v11, %v2912_v6 }
 0x323   : > { %v1862_v6 = vsel %vm301_vm0, %v1857_v1, 0 }
 0x324   : > { %v1636_v29 = vpop.f32.mrf.mxu0  ;;  %v1663_v42 = vpop.f32.mrf.mxu1 }
 0x327   : > { %v1574_v24 = vpop.f32.mrf.mxu2 }
 0x328   : > { %v1599_v17 = vpop.f32.mrf.mxu3  ;;  %v1575_v27 = vadd.f32 %v1574_v24, %v1544_v25  ;;  %v568_v24 = vadd.f32 %v3018_v38, %v3010_v33  ;;  %v603_v33 = vadd.f32 %v3014_v35, %v572_v47 }
 0x329   : > { %v1600_v19 = vadd.f32 %v1599_v17, %v1570_v16  ;;  %v1890_v16 = vand.u32 4294901760, %v1862_v6 }
 0x32a   : > { %v634_v37 = vadd.f32 %v3020_v39, %v603_v33  ;;  %v2247_v39 = vmul.f32 %v3064_v56, %v3064_v56 }
 0x32b   : > { %v1633_v23 = vadd.f32 %v1632_v15, %v1600_v19  ;;  %v1884_v15 = vand.u32 4294901760, %v1883_v8 }
 0x32d   : > { %v1660_v26 = vadd.f32 %v1659_v18, %v1633_v23 }
 0x32f   : > { %v1682_v30 = vand.u32 4294901760, %v1660_v26 }
 0x330   : > { %v1605_v28 = vpop.f32.mrf.mxu3 }
 0x331   : > { %v1606_v31 = vadd.f32 %v1605_v28, %v1575_v27  ;;  %v1722_v43 = vsub.f32 %v1660_v26, %v1682_v30  ;;  %v598_v28 = vadd.f32 %v3008_v32, %v568_v24 }
 0x333   : > { %v1637_v52 = vadd.f32 %v1636_v29, %v1606_v31  ;;  %v1723_v60 = vand.u32 4294901760, %v1722_v43 }
 0x335   : > { %v1664_v53 = vadd.f32 %v1663_v42, %v1637_v52  ;;  %v1724_v55 = vsub.f32 %v1722_v43, %v1723_v60  ;;  %v628_v42 = vadd.f32 %v3012_v34, %v598_v28 }
 0x337   : > { %v1680_v57 = vand.u32 4294901760, %v1664_v53  ;;  %v1725_v11 = vand.u32 4294901760, %v1724_v55  ;;  %v661_v54 = vadd.f32 %v3024_v41, %v628_v42 }
 0x339   : > { %v1716_v59 = vsub.f32 %v1664_v53, %v1680_v57  ;;  %1681 = vmatpush.msra.mxu2 %v1680_v57  ;;  %1782 = vmatpush.msrb.mxu1 %v1680_v57  ;;  %v3139_v38 = vadd.f32 %v3028_v46, %v661_v54 }
 0x33b   : > { %v1717_v5 = vand.u32 4294901760, %v1716_v59  ;;  %1683 = vmatpush.msra.mxu2 %v1682_v30  ;;  %1752 = vmatpush.msrb.mxu0 %v1716_v59  ;;  %v2244_v40 = vmul.f32 %v3139_v38, %v3139_v38 }
 0x33c   : > { %1784 = vmatpush.msrb.mxu1 %v1682_v30  ;;  %1689 = vmatmul.f32.vlgmr.msra.gmra.mxu2 %v2970_v63 }
 0x33d   : > { %v1718_v2 = vsub.f32 %v1716_v59, %v1717_v5  ;;  %1755 = vmatpush.msrb.mxu0 %v1722_v43  ;;  %1815 = vmatpush.msrb.mxu2 %v1717_v5  ;;  %v665_v5 = vadd.f32 %v3026_v45, %v634_v37  ;;  %v2250_v46 = vsub.f32 %v3096_v61, %v2244_v40 }
 0x33e   : > { %1758 = vmatmul.f32.vlgmr.msrb.gmra.mxu0 %v2952_v44  ;;  %1788 = vmatmul.f32.vlgmr.msrb.gmra.mxu1 %v2956_v49 }
 0x33f   : > { %1819 = vmatpush.msrb.mxu2 %v1723_v60  ;;  %v1719_v12 = vand.u32 4294901760, %v1718_v2  ;;  %1879 = vmatpush.msra.mxu0 %v2906_v3  ;;  %v2246_v60 = vmul.f32 %v3062_v51, %v3062_v51 }
 0x340   : > { %1918 = vmatpush.msra.mxu1 %v2939_v21  ;;  %v1891_v21 = vsub.f32 %v1862_v6, %v1890_v16 }
 0x341   : > { %1950 = vmatpush.msra.mxu2 %v2917_v9  ;;  %1720 = vmatpush.msra.mxu3 %v1719_v12  ;;  %v1885_v9 = vsub.f32 %v1883_v8, %v1884_v15  ;;  %v2266_v35 = vadd.f32 %v2246_v60, %v2244_v40 }
 0x342   : > { %1881 = vmatpush.msra.mxu0 %v2908_v4  ;;  %1924 = vmatpush.msra.mxu1 %v2941_v22 }
 0x343   : > { %1953 = vmatpush.msra.mxu2 %v2921_v10  ;;  %1726 = vmatpush.msra.mxu3 %v1725_v11  ;;  %v1886_v10 = vand.u32 4294901760, %v1885_v9  ;;  %v2268_v6 = vadd.f32 0.0001, %v2266_v35 }
 0x344   : > { %2013 = vmatpush.msrb.mxu0 %v2927_v13  ;;  %1697 = vmatmul.f32.gmra.mxu2 %v2986_v20  ;;  %v1892_v13 = vand.u32 4294901760, %v1891_v21 }
 0x345   : > { %1728 = vmatmul.f32.vlgmr.msra.gmra.mxu3 %v2949_v36  ;;  %2042 = vmatpush.msrb.mxu1 %v2906_v3 }
 0x346   : > { %1844 = vmatpush.msrb.mxu3 %v1680_v57  ;;  %2017 = vmatpush.msrb.mxu0 %v2930_v14  ;;  %v1893_v14 = vsub.f32 %v1891_v21, %v1892_v13 }
 0x347   : > { %1763 = vmatmul.f32.gmra.mxu0 %v2966_v58  ;;  %1794 = vmatmul.f32.gmra.mxu1 %v2973_v0 }
 0x348   : > { %1846 = vmatpush.msrb.mxu3 %v1682_v30  ;;  %2044 = vmatpush.msrb.mxu1 %v2908_v4  ;;  %v1894_v22 = vand.u32 4294901760, %v1893_v14 }
 0x34a   : > { %1980 = vmatpush.msra.mxu3 %v2906_v3 }
 0x34c   : > { %1982 = vmatpush.msra.mxu3 %v2908_v4  ;;  %1821 = vmatmul.f32.vlgmr.msrb.gmra.mxu2 %v2949_v36 }
 0x34d   : > { %1732 = vmatmul.f32.gmra.mxu3 %v2958_v50 }
 0x34f   : > { %1887 = vmatmul.f32.vlgmr.msra.gmra.mxu0 %v1886_v10  ;;  %1926 = vmatmul.f32.vlgmr.msra.gmra.mxu1 %v1882_v62 }
 0x354   : > { %1825 = vmatmul.f32.gmra.mxu2 %v2958_v50 }
 0x355   : > { %1848 = vmatmul.f32.vlgmr.msrb.gmra.mxu3 %v2949_v36 }
 0x357   : > { %1895 = vmatmul.f32.gmra.mxu0 %v1894_v22  ;;  %1930 = vmatmul.f32.gmra.mxu1 %v1890_v16 }
 0x35c   : > { %1956 = vmatmul.f32.vlgmr.msra.gmra.mxu2 %v1883_v8  ;;  %v3149_v8 = vadd.f32 %v3030_v48, %v665_v5 }
 0x35d   : > { %1852 = vmatmul.f32.gmra.mxu3 %v2958_v50 }
 0x35e   : > { %v2245_v9 = vmul.f32 %v3149_v8, %v3149_v8 }
 0x35f   : > { %2019 = vmatmul.f32.vlgmr.msrb.gmra.mxu0 %v1882_v62  ;;  %2046 = vmatmul.f32.vlgmr.msrb.gmra.mxu1 %v1882_v62 }
 0x360   : > { %v2267_v10 = vadd.f32 %v2247_v39, %v2245_v9 }
 0x364   : > { %1961 = vmatmul.f32.gmra.mxu2 %v1891_v21 }
 0x365   : > { %1986 = vmatmul.f32.vlgmr.msra.gmra.mxu3 %v1884_v15 }
 0x367   : > { %2023 = vmatmul.f32.gmra.mxu0 %v1890_v16  ;;  %2050 = vmatmul.f32.gmra.mxu1 %v1890_v16 }
 0x36d   : > { %1992 = vmatmul.f32.gmra.mxu3 %v1892_v13  ;;  %v2251_v13 = vsub.f32 %v3098_v7, %v2245_v9 }
 0x3bb   : > { %v1759_v3 = vpop.f32.mrf.mxu0  ;;  %v1789_v17 = vpop.f32.mrf.mxu1 }
 0x3bf   : > { %v1690_v4 = vpop.f32.mrf.mxu2 }
 0x3c4   : > { %v1764_v18 = vpop.f32.mrf.mxu0  ;;  %v1795_v27 = vpop.f32.mrf.mxu1 }
 0x3c7   : > { %v1698_v19 = vpop.f32.mrf.mxu2 }
 0x3c8   : > { %v1729_v23 = vpop.f32.mrf.mxu3 }
 0x3c9   : > { %v1730_v25 = vadd.f32 %v1729_v23, %v1690_v4  ;;  %v2269_v4 = vadd.f32 0.0001, %v2267_v10 }
 0x3cb   : > { %v1760_v26 = vadd.f32 %v1759_v3, %v1730_v25 }
 0x3cc   : > { %v1888_v53 = vpop.f32.mrf.mxu0  ;;  %v1927_v59 = vpop.f32.mrf.mxu1 }
 0x3cd   : > { %v1790_v29 = vadd.f32 %v1789_v17, %v1760_v26  ;;  %v1928_v14 = vadd.f32 %v1927_v59, %v1888_v53 }
 0x3cf   : > { %v1822_v31 = vpop.f32.mrf.mxu2 }
 0x3d0   : > { %v1733_v30 = vpop.f32.mrf.mxu3  ;;  %v1823_v43 = vadd.f32 %v1822_v31, %v1790_v29 }
 0x3d1   : > { %v1734_v52 = vadd.f32 %v1733_v30, %v1698_v19 }
 0x3d3   : > { %v1765_v57 = vadd.f32 %v1764_v18, %v1734_v52 }
 0x3d4   : > { %v1896_v55 = vpop.f32.mrf.mxu0  ;;  %v1931_v16 = vpop.f32.mrf.mxu1 }
 0x3d5   : > { %v1796_v32 = vadd.f32 %v1795_v27, %v1765_v57  ;;  %v1932_v28 = vadd.f32 %v1931_v16, %v1896_v55 }
 0x3d7   : > { %v1826_v34 = vpop.f32.mrf.mxu2 }
 0x3d8   : > { %v1849_v62 = vpop.f32.mrf.mxu3  ;;  %v1827_v1 = vadd.f32 %v1826_v34, %v1796_v32 }
 0x3d9   : > { %v1850_v41 = vadd.f32 %v1849_v62, %v1823_v43 }
 0x3db   : > { %v2252_v2 = vsub.f32 %v1850_v41, %v2246_v60 }
 0x3dc   : > { %v2020_v3 = vpop.f32.mrf.mxu0  ;;  %v2047_v23 = vpop.f32.mrf.mxu1 }
 0x3dd   : > { %v2270_v12 = vadd.f32 %v2252_v2, %v2250_v46  ;;  %v2248_v2 = vmul.f32 %v3062_v51, %v3139_v38 }
 0x3df   : > { %v2272_v11 = vadd.f32 0.0009, %v2270_v12  ;;  %v1957_v61 = vpop.f32.mrf.mxu2 }
 0x3e0   : > { %v1853_v15 = vpop.f32.mrf.mxu3  ;;  %v1958_v18 = vadd.f32 %v1957_v61, %v1928_v14  ;;  %v2249_v61 = vmul.f32 %v3064_v56, %v3149_v8 }
 0x3e1   : > { %v3155_v45 = vmul.f32 %v2272_v11, %v2268_v6  ;;  %v1854_v21 = vadd.f32 %v1853_v15, %v1827_v1 }
 0x3e3   : > { %v2253_v48 = vsub.f32 %v1854_v21, %v2247_v39  ;;  %v2256_v39 = vmul.f32 2.0, %v2248_v2  ;;  %2519 = vrcp.f32 %v3155_v45 }
 0x3e4   : > { %v2024_v42 = vpop.f32.mrf.mxu0  ;;  %v2051_v52 = vpop.f32.mrf.mxu1 }
 0x3e5   : > { %v2271_v22 = vadd.f32 %v2253_v48, %v2251_v13  ;;  %v2258_v21 = vadd.f32 0.0001, %v2256_v39 }
 0x3e7   : > { %v2273_v17 = vadd.f32 0.0009, %v2271_v22  ;;  %v1962_v27 = vpop.f32.mrf.mxu2  ;;  %v2257_v22 = vmul.f32 2.0, %v2249_v61 }
 0x3e8   : > { %v1987_v19 = vpop.f32.mrf.mxu3  ;;  %v1963_v30 = vadd.f32 %v1962_v27, %v1932_v28 }
 0x3e9   : > { %v3158_v24 = vmul.f32 %v2273_v17, %v2269_v4  ;;  %v1988_v25 = vadd.f32 %v1987_v19, %v1958_v18  ;;  %v2520_v14 = vpop.eup %2519  ;;  %v2259_v18 = vadd.f32 0.0001, %v2257_v22 }
 0x3eb   : > { %v2021_v26 = vadd.f32 %v2020_v3, %v1988_v25  ;;  %2521 = vrcp.f32 %v3158_v24 }
 0x3ed   : > { %v2048_v29 = vadd.f32 %v2047_v23, %v2021_v26 }
 0x3ef   : > { %v2070_v7 = vand.u32 4294901760, %v2048_v29 }
 0x3f0   : > { %v1993_v31 = vpop.f32.mrf.mxu3 }
 0x3f1   : > { %v1994_v47 = vadd.f32 %v1993_v31, %v1963_v30  ;;  %v2110_v53 = vsub.f32 %v2048_v29, %v2070_v7  ;;  %v2522_v8 = vpop.eup %2521 }
 0x3f3   : > { %v2025_v43 = vadd.f32 %v2024_v42, %v1994_v47  ;;  %v2111_v32 = vand.u32 4294901760, %v2110_v53 }
 0x3f5   : > { %v2052_v54 = vadd.f32 %v2051_v52, %v2025_v43  ;;  %v2112_v34 = vsub.f32 %v2110_v53, %v2111_v32 }
 0x3f7   : > { %v2068_v57 = vand.u32 4294901760, %v2052_v54  ;;  %v2113_v37 = vand.u32 4294901760, %v2112_v34 }
 0x3f9   : > { %v2104_v33 = vsub.f32 %v2052_v54, %v2068_v57  ;;  %2069 = vmatpush.msrb.mxu2 %v2068_v57  ;;  %2170 = vmatpush.msra.mxu1 %v2068_v57 }
 0x3fb   : > { %v2105_v59 = vand.u32 4294901760, %v2104_v33  ;;  %2071 = vmatpush.msrb.mxu2 %v2070_v7  ;;  %2140 = vmatpush.msra.mxu0 %v2104_v33 }
 0x3fc   : > { %2172 = vmatpush.msra.mxu1 %v2070_v7  ;;  %2077 = vmatmul.f32.vlgmr.msrb.gmra.mxu2 %v2970_v63 }
 0x3fd   : > { %v2106_v60 = vsub.f32 %v2104_v33, %v2105_v59  ;;  %2143 = vmatpush.msra.mxu0 %v2110_v53  ;;  %2203 = vmatpush.msra.mxu2 %v2105_v59 }
 0x3fe   : > { %2146 = vmatmul.f32.vlgmr.msra.gmra.mxu0 %v2952_v44  ;;  %2176 = vmatmul.f32.vlgmr.msra.gmra.mxu1 %v2956_v49 }
 0x3ff   : > { %2207 = vmatpush.msra.mxu2 %v2111_v32  ;;  %v2107_v62 = vand.u32 4294901760, %v2106_v60 }
 0x401   : > { %2108 = vmatpush.msrb.mxu3 %v2107_v62 }
 0x403   : > { %2114 = vmatpush.msrb.mxu3 %v2113_v37 }
 0x404   : > { %2116 = vmatmul.f32.vlgmr.msrb.gmra.mxu3 %v2949_v36  ;;  %2085 = vmatmul.f32.gmra.mxu2 %v2986_v20 }
 0x405   : > { %2232 = vmatpush.msra.mxu3 %v2068_v57 }
 0x406   : > { %2151 = vmatmul.f32.gmra.mxu0 %v2966_v58  ;;  %2182 = vmatmul.f32.gmra.mxu1 %v2973_v0 }
 0x407   : > { %2234 = vmatpush.msra.mxu3 %v2070_v7 }
 0x40c   : > { %2120 = vmatmul.f32.gmra.mxu3 %v2958_v50  ;;  %2209 = vmatmul.f32.vlgmr.msra.gmra.mxu2 %v2949_v36 }
 0x414   : > { %2236 = vmatmul.f32.vlgmr.msra.gmra.mxu3 %v2949_v36  ;;  %2213 = vmatmul.f32.gmra.mxu2 %v2958_v50 }
 0x41c   : > { %2240 = vmatmul.f32.gmra.mxu3 %v2958_v50 }
 0x47b   : > { %v2147_v20 = vpop.f32.mrf.mxu0  ;;  %v2177_v58 = vpop.f32.mrf.mxu1 }
 0x47f   : > { %v2078_v44 = vpop.f32.mrf.mxu2 }
 0x483   : > { %v2152_v46 = vpop.f32.mrf.mxu0  ;;  %v2183_v50 = vpop.f32.mrf.mxu1 }
 0x487   : > { %v2117_v49 = vpop.f32.mrf.mxu3  ;;  %v2086_v63 = vpop.f32.mrf.mxu2 }
 0x488   : > { %v2118_v40 = vadd.f32 %v2117_v49, %v2078_v44 }
 0x48a   : > { %v2148_v41 = vadd.f32 %v2147_v20, %v2118_v40 }
 0x48c   : > { %v2178_v35 = vadd.f32 %v2177_v58, %v2148_v41 }
 0x48f   : > { %v2121_v1 = vpop.f32.mrf.mxu3  ;;  %v2210_v0 = vpop.f32.mrf.mxu2 }
 0x490   : > { %v2122_v5 = vadd.f32 %v2121_v1, %v2086_v63  ;;  %v2211_v36 = vadd.f32 %v2210_v0, %v2178_v35 }
 0x492   : > { %v2153_v6 = vadd.f32 %v2152_v46, %v2122_v5 }
 0x494   : > { %v2184_v9 = vadd.f32 %v2183_v50, %v2153_v6 }
 0x497   : > { %v2237_v55 = vpop.f32.mrf.mxu3  ;;  %v2214_v15 = vpop.f32.mrf.mxu2 }
 0x498   : > { %v2238_v12 = vadd.f32 %v2237_v55, %v2211_v36  ;;  %v2215_v13 = vadd.f32 %v2214_v15, %v2184_v9 }
 0x49a   : > { %v2254_v11 = vsub.f32 %v2238_v12, %v2248_v2 }
 0x49c   : > { %v2260_v16 = vmul.f32 2.0, %v2254_v11 }
 0x49e   : > { %v2262_v10 = vadd.f32 0.0009, %v2260_v16 }
 0x49f   : > { %v2241_v48 = vpop.f32.mrf.mxu3 }
 0x4a0   : > { %v2242_v51 = vadd.f32 %v2241_v48, %v2215_v13  ;;  %v2264_v38 = vmul.f32 %v2262_v10, %v2258_v21 }
 0x4a2   : > { %v2255_v3 = vsub.f32 %v2242_v51, %v2249_v61  ;;  %v2278_v4 = vmul.f32 %v2520_v14, %v2264_v38 }
 0x4a4   : > { %v2261_v45 = vmul.f32 2.0, %v2255_v3  ;;  %v2280_v17 = vsel %vm301_vm0, %v2278_v4, 0.0 }
 0x4a5   : > { %2281 = vadd.xlane.f32.xlu0 %v2280_v17 }
 0x4a6   : > { %v2263_v19 = vadd.f32 0.0009, %v2261_v45 }
 0x4a8   : > { %v2265_v56 = vmul.f32 %v2263_v19, %v2259_v18 }
 0x4aa   : > { %v2279_v23 = vmul.f32 %v2522_v8, %v2265_v56 }
 0x4ac   : > { %v2283_v25 = vsel %vm301_vm0, %v2279_v23, 0.0 }
 0x4ad   : > { %2284 = vadd.xlane.f32.xlu0 %v2283_v25 }
 0x518   : > { %v2282_v26 = vpop.xlane.xlu0 %2281 }
 0x520   : > { %v2285_v27 = vpop.xlane.xlu0 %2284 }
 0x521   : > { %v2286_v28 = vadd.f32 %v2285_v27, %v2282_v26 }
 0x523   : > { %v2287_v29 = vrot.slane %v2286_v28, 4 }
 0x525   : > { %v2288_v24 = vadd.f32 %v2287_v29, %v2286_v28 }
 0x527   : > { %v2289_v30 = vrot.slane %v2288_v24, 2 }
 0x529   : > { %v2290_v31 = vadd.f32 %v2289_v30, %v2288_v24 }
 0x52b   : > { %v2291_v42 = vrot.slane %v2290_v31, 1 }
 0x52d   : > { %v2292_v7 = vadd.f32 %v2291_v42, %v2290_v31 }
 0x52f   : > { %2293 = vst [vmem:[%s292_s27] sm:$0xff] %v2292_v7 }
 0x530   : > { %2670 = shalt.err (!%p2667_p10)
}
 0x531   : > { %2457 = dma.vmem_to_hbm [thread:$0]  (%p2823_p0), %s2308_s28, 128, %s2310_s9, %s2295_s2  }
 0x532 PF: > { %p2482_p11 = scmp.ge.s32.totalorder %s2721_s18, 2  ;;  %s2321_s23 = sand.u32 1, %s2709_s15  }
 0x533   : > { %s2322_s30 = scalar_lea.sflag [#allocation4], %s2321_s23 }
 0x534   : > { %p2474_p12 = pnand %p2482_p11, %p2787_p6 }
 0x536   : > { %p2475_p13 = pneg %p2474_p12 }
 0x538   : > { %2704 = dma.done.wait (%p2475_p13), %s2322_s30, 128  }
 0x539   : > { %2706 = vsyncadd (%p2475_p13), %s2322_s30, 4294967168  ;;  %p21_p3 = scmp.ge.s32.totalorder %s2813_s10, 10   ;;  %s3235_s15 = smov %s2713_s16 }
 0x53a   : > { %s3236_s16 = smov %s2717_s17  ;;  %s3237_s17 = smov %s2829_s14 }
 0x53b   : > { %s3238_s18 = smov %s2813_s10  ;;  %23 = sbr.rel (!%p21_p3) target bundleno = 12 (0xc), region = 102 }
 0x540   :  { %2328 = vsyncpa [#allocation3], 1 }
 0x541   :  { %2330 = vsyncpa [#allocation3 + $0x1], 1 }
 0x542   :  { %2331 = vsyncpa [#allocation6], 1 }
 0x543   :  { %2333 = vsyncpa [#allocation6 + $0x1], 1 }
 0x544   :  { %2334 = vsyncpa [#allocation9], 1 }
 0x545   :  { %2335 = vsyncpa [#allocation4], 1 }
 0x546   :  { %2337 = vsyncpa [#allocation4 + $0x1], 1 }

</bundles_post_ra>
